<compile_context>
chip_gen: v6e
topology: v6e:2x2x1
jax: 0.10.0
libtpu: 0.0.40
codegen_flags: <defaults>
</compile_context>

<pallas_src>
import jax
import jax.numpy as jnp
from jax.experimental import pallas as pl
from jax.experimental.pallas import tpu as pltpu


def edge_model_kernel(src_ref, dest_ref, edge_ref,
                      w0a_ref, w0b_ref, w0c_ref, b0_ref, *rest):
    """Fused (implicit-concat) MLP kernel.

    rest = (w1, b1, w2, b2, ..., out_ref).  Layer 0 is computed as three
    accumulating matmuls against the three chunks of W0, which equals
    concat([src, dest, edge]) @ W0.
    """
    out_ref = rest[-1]
    wb_refs = rest[:-1]
    n_rest = len(wb_refs) // 2  # linear layers after the first

    f32 = jnp.float32
    # Layer 0: src@W0a + dest@W0b + edge@W0c + b0 (MXU, f32 accumulate).
    x = jnp.dot(src_ref[...], w0a_ref[...], preferred_element_type=f32)
    x = x + jnp.dot(dest_ref[...], w0b_ref[...], preferred_element_type=f32)
    x = x + jnp.dot(edge_ref[...], w0c_ref[...], preferred_element_type=f32)
    x = x + b0_ref[...]                     # bias kept in f32

    if n_rest > 0:
        x = x * jax.nn.sigmoid(x)           # SiLU on the f32 accumulator

    for k in range(n_rest):
        w = wb_refs[2 * k]
        b = wb_refs[2 * k + 1]
        x = jnp.dot(x.astype(w.dtype), w[...], preferred_element_type=f32) + b[...]
        if k < n_rest - 1:
            x = x * jax.nn.sigmoid(x)

    out_ref[...] = x.astype(out_ref.dtype)


def _block_diag(w, fold):
    """fold diagonal copies of w -> (fold*in, fold*out). fold==1 returns w."""
    if fold == 1:
        return w
    d_in, d_out = w.shape
    out = jnp.zeros((fold * d_in, fold * d_out), w.dtype)
    for i in range(fold):
        out = out.at[i * d_in:(i + 1) * d_in, i * d_out:(i + 1) * d_out].set(w)
    return out


def edge_model_forward(src, dest, edge_attr, weights, biases, *, tile_m=4096):
    """src, dest, edge_attr: (E, D). weights[k]: (in_k, out_k), biases[k]: (out_k,).

    Inputs may be float32 or bfloat16; output keeps the input dtype.
    Accumulation is float32 inside the kernel.
    """
    E, D = src.shape
    n_layers = len(weights)
    out_dim = weights[-1].shape[1]
    assert weights[0].shape[0] == 3 * D, "first layer must take concat([src,dest,edge])"

    in_dtype = src.dtype
    itemsize = jnp.dtype(in_dtype).itemsize

    # --- lane-folding factor: pack `fold` rows into one 128-lane row ---------
    fold = 1
    if D < 128 and 128 % D == 0 and E % (128 // D) == 0:
        fold = 128 // D
    E_f = E // fold
    D_f = D * fold
    out_f = out_dim * fold

    if fold > 1:
        # Contiguous row-major reshape: free, no data movement.
        src = src.reshape(E_f, D_f)
        dest = dest.reshape(E_f, D_f)
        edge_attr = edge_attr.reshape(E_f, D_f)

    # --- row tile (in folded rows): large, no input padding ------------------
    tile_f = max(1, tile_m // fold)
    if tile_f >= E_f:
        tile_f = E_f                        # single block == full array dim (legal)
    else:
        tile_f = max(8, (tile_f // 8) * 8)  # multiple of 8 sublanes
    grid = (pl.cdiv(E_f, tile_f),)          # ragged last block masked by Pallas

    # --- parameters: split W0, block-diagonalize, lane-tile biases -----------
    w_dtype = in_dtype                      # feed the MXU natively; accumulate f32
    w0 = weights[0]
    w0a = _block_diag(w0[:D, :], fold).astype(w_dtype)
    w0b = _block_diag(w0[D:2 * D, :], fold).astype(w_dtype)
    w0c = _block_diag(w0[2 * D:3 * D, :], fold).astype(w_dtype)
    b0 = jnp.tile(biases[0].astype(jnp.float32), fold).reshape(1, -1)

    rest_params = []
    for w, b in zip(weights[1:], biases[1:]):
        rest_params.append(_block_diag(w, fold).astype(w_dtype))
        rest_params.append(jnp.tile(b.astype(jnp.float32), fold).reshape(1, -1))

    param_arrays = [w0a, w0b, w0c, b0] + rest_params

    row_spec = pl.BlockSpec((tile_f, D_f), lambda i: (i, 0))
    const_map = lambda i: (0, 0)            # params: same block every step -> loaded once
    param_specs = [pl.BlockSpec(p.shape, const_map) for p in param_arrays]
    out_spec = pl.BlockSpec((tile_f, out_f), lambda i: (i, 0))

    # --- VMEM bookkeeping (only raise the limit when big tiles need it) ------
    param_bytes = sum(int(p.size) * jnp.dtype(p.dtype).itemsize for p in param_arrays)
    vmem_need = 2 * (3 * tile_f * D_f + tile_f * out_f) * itemsize + param_bytes
    vmem_limit = None
    if vmem_need > 12 * 1024 * 1024:
        vmem_limit = int(min(2 * vmem_need, 64 * 1024 * 1024))

    # --- advisory cost estimate (logical work / true HBM traffic) ------------
    flops = 2 * E * (3 * D) * weights[0].shape[1]
    for w in weights[1:]:
        flops += 2 * E * w.shape[0] * w.shape[1]
    transcendentals = E * out_dim * max(n_layers - 1, 0)
    bytes_accessed = E * 3 * D * itemsize + E * out_dim * itemsize + param_bytes

    out = pl.pallas_call(
        edge_model_kernel,
        out_shape=jax.ShapeDtypeStruct((E_f, out_f), in_dtype),
        grid_spec=pltpu.PrefetchScalarGridSpec(
            num_scalar_prefetch=0,
            grid=grid,
            in_specs=[row_spec, row_spec, row_spec] + param_specs,
            out_specs=out_spec,
        ),
        compiler_params=pltpu.CompilerParams(
            dimension_semantics=("parallel",),
            vmem_limit_bytes=vmem_limit,
        ),
        cost_estimate=pl.CostEstimate(
            flops=int(flops),
            transcendentals=int(transcendentals),
            bytes_accessed=int(bytes_accessed),
        ),
    )(src, dest, edge_attr, *param_arrays)

    if fold > 1:
        out = out.reshape(E, out_dim)       # free contiguous reshape back
    return out


def init_edge_model_params(key, n_hidden, dim_hidden):
    """Deterministic init matching MLP([3*D] + n_hidden*[D] + [D])."""
    layer_vec = [3 * dim_hidden] + n_hidden * [dim_hidden] + [dim_hidden]
    weights, biases = [], []
    for k in range(len(layer_vec) - 1):
        fan_in, fan_out = layer_vec[k], layer_vec[k + 1]
        key, wk, bk = jax.random.split(key, 3)
        bound = 1.0 / (fan_in ** 0.5)
        # stored (in, out): kernel computes x @ W (== torch x @ W.T with W (out,in))
        w = jax.random.uniform(wk, (fan_in, fan_out), jnp.float32, -bound, bound)
        b = jax.random.uniform(bk, (fan_out,), jnp.float32, -bound, bound)
        weights.append(w)
        biases.append(b)
    return weights, biases


def edge_model_reference(src, dest, edge_attr, weights, biases):
    x = jnp.concatenate([src, dest, edge_attr], axis=1).astype(jnp.float32)
    n = len(weights)
    for i, (w, b) in enumerate(zip(weights, biases)):
        x = jnp.dot(x, w, preferred_element_type=jnp.float32) + b
        if i < n - 1:
            x = x * jax.nn.sigmoid(x)
    return x


if __name__ == "__main__":
    n_hidden = 2
    dim_hidden = 32
    num_edges = 200  # divisible by fold=4, NOT by the row tile -> exercises boundary path

    key = jax.random.PRNGKey(0)
    key, ks, kd, ke = jax.random.split(key, 4)
    src = jax.random.normal(ks, (num_edges, dim_hidden), jnp.float32)
    dest = jax.random.normal(kd, (num_edges, dim_hidden), jnp.float32)
    edge_attr = jax.random.normal(ke, (num_edges, dim_hidden), jnp.float32)

    weights, biases = init_edge_model_params(key, n_hidden, dim_hidden)

    # --- float32 I/O, lane-folded path ---
    out = edge_model_forward(src, dest, edge_attr, weights, biases)
    out = jax.block_until_ready(out)
    ref = edge_model_reference(src, dest, edge_attr, weights, biases)
    assert out.shape == (num_edges, dim_hidden)
    assert jnp.allclose(out, ref, atol=2e-3, rtol=2e-3), "f32 mismatch vs reference"

    # --- unfolded fallback (E not divisible by 4) + ragged block masking ---
    E2 = num_edges - 1
    out2 = edge_model_forward(src[:E2], dest[:E2], edge_attr[:E2], weights, biases)
    out2 = jax.block_until_ready(out2)
    assert out2.shape == (E2, dim_hidden)
    assert jnp.allclose(out2, ref[:E2], atol=2e-3, rtol=2e-3), "fallback mismatch"

    # --- bfloat16 I/O path (halves HBM traffic; accumulation stays f32) ---
    src_bf = src.astype(jnp.bfloat16)
    dest_bf = dest.astype(jnp.bfloat16)
    edge_bf = edge_attr.astype(jnp.bfloat16)
    out_bf = edge_model_forward(src_bf, dest_bf, edge_bf, weights, biases)
    out_bf = jax.block_until_ready(out_bf)
    ref_bf = edge_model_reference(src_bf.astype(jnp.float32),
                                  dest_bf.astype(jnp.float32),
                                  edge_bf.astype(jnp.float32),
                                  weights, biases)
    assert out_bf.dtype == jnp.bfloat16
    assert jnp.allclose(out_bf.astype(jnp.float32), ref_bf, atol=3e-2, rtol=3e-2), \
        "bf16 mismatch vs reference"

    print("KERNEL_OK")
</pallas_src>

<mosaic_0001>
module attributes {stable_mosaic.version = 11 : i64} {
  func.func @edge_model_kernel(%arg0: i32, %arg1: memref<50x128xf32, #tpu.memory_space<vmem>>, %arg2: memref<50x128xf32, #tpu.memory_space<vmem>>, %arg3: memref<50x128xf32, #tpu.memory_space<vmem>>, %arg4: memref<128x128xf32, #tpu.memory_space<vmem>>, %arg5: memref<128x128xf32, #tpu.memory_space<vmem>>, %arg6: memref<128x128xf32, #tpu.memory_space<vmem>>, %arg7: memref<1x128xf32, #tpu.memory_space<vmem>>, %arg8: memref<128x128xf32, #tpu.memory_space<vmem>>, %arg9: memref<1x128xf32, #tpu.memory_space<vmem>>, %arg10: memref<128x128xf32, #tpu.memory_space<vmem>>, %arg11: memref<1x128xf32, #tpu.memory_space<vmem>>, %arg12: memref<50x128xf32, #tpu.memory_space<vmem>>) attributes {dimension_semantics = [#tpu.dimension_semantics<parallel>], iteration_bounds = array<i64: 1>, scalar_prefetch = 0 : i64, scratch_operands = 0 : i64, tpu.core_type = #tpu.core_type<tc>, window_params = [{transform_indices = @transform_0, window_bounds = array<i64: 50, 128>}, {transform_indices = @transform_1, window_bounds = array<i64: 50, 128>}, {transform_indices = @transform_2, window_bounds = array<i64: 50, 128>}, {pipeline_mode = #tpu.pipeline_mode<synchronous>, transform_indices = @transform_3, window_bounds = array<i64: 128, 128>}, {pipeline_mode = #tpu.pipeline_mode<synchronous>, transform_indices = @transform_4, window_bounds = array<i64: 128, 128>}, {pipeline_mode = #tpu.pipeline_mode<synchronous>, transform_indices = @transform_5, window_bounds = array<i64: 128, 128>}, {pipeline_mode = #tpu.pipeline_mode<synchronous>, transform_indices = @transform_6, window_bounds = array<i64: 1, 128>}, {pipeline_mode = #tpu.pipeline_mode<synchronous>, transform_indices = @transform_7, window_bounds = array<i64: 128, 128>}, {pipeline_mode = #tpu.pipeline_mode<synchronous>, transform_indices = @transform_8, window_bounds = array<i64: 1, 128>}, {pipeline_mode = #tpu.pipeline_mode<synchronous>, transform_indices = @transform_9, window_bounds = array<i64: 128, 128>}, {pipeline_mode = #tpu.pipeline_mode<synchronous>, transform_indices = @transform_10, window_bounds = array<i64: 1, 128>}, {transform_indices = @transform_11, window_bounds = array<i64: 50, 128>}]} {
    %c0 = arith.constant 0 : index
    %c0_0 = arith.constant 0 : index
    %0 = vector.load %arg1[%c0, %c0_0] : memref<50x128xf32, #tpu.memory_space<vmem>>, vector<50x128xf32>
    %c0_1 = arith.constant 0 : index
    %c0_2 = arith.constant 0 : index
    %1 = vector.load %arg4[%c0_1, %c0_2] : memref<128x128xf32, #tpu.memory_space<vmem>>, vector<128x128xf32>
    %cst = arith.constant dense<0.000000e+00> : vector<50x128xf32>
    %2 = tpu.matmul %0, %1, %cst {dimension_numbers = #tpu.dot_dimension_numbers<[1], [0], [0], [1], [0, 0, 1, 1], [], []>} : vector<50x128xf32>, vector<128x128xf32>, vector<50x128xf32> -> vector<50x128xf32>
    %c0_3 = arith.constant 0 : index
    %c0_4 = arith.constant 0 : index
    %3 = vector.load %arg2[%c0_3, %c0_4] : memref<50x128xf32, #tpu.memory_space<vmem>>, vector<50x128xf32>
    %c0_5 = arith.constant 0 : index
    %c0_6 = arith.constant 0 : index
    %4 = vector.load %arg5[%c0_5, %c0_6] : memref<128x128xf32, #tpu.memory_space<vmem>>, vector<128x128xf32>
    %cst_7 = arith.constant dense<0.000000e+00> : vector<50x128xf32>
    %5 = tpu.matmul %3, %4, %cst_7 {dimension_numbers = #tpu.dot_dimension_numbers<[1], [0], [0], [1], [0, 0, 1, 1], [], []>} : vector<50x128xf32>, vector<128x128xf32>, vector<50x128xf32> -> vector<50x128xf32>
    %6 = arith.addf %2, %5 : vector<50x128xf32>
    %c0_8 = arith.constant 0 : index
    %c0_9 = arith.constant 0 : index
    %7 = vector.load %arg3[%c0_8, %c0_9] : memref<50x128xf32, #tpu.memory_space<vmem>>, vector<50x128xf32>
    %c0_10 = arith.constant 0 : index
    %c0_11 = arith.constant 0 : index
    %8 = vector.load %arg6[%c0_10, %c0_11] : memref<128x128xf32, #tpu.memory_space<vmem>>, vector<128x128xf32>
    %cst_12 = arith.constant dense<0.000000e+00> : vector<50x128xf32>
    %9 = tpu.matmul %7, %8, %cst_12 {dimension_numbers = #tpu.dot_dimension_numbers<[1], [0], [0], [1], [0, 0, 1, 1], [], []>} : vector<50x128xf32>, vector<128x128xf32>, vector<50x128xf32> -> vector<50x128xf32>
    %10 = arith.addf %6, %9 : vector<50x128xf32>
    %c0_13 = arith.constant 0 : index
    %c0_14 = arith.constant 0 : index
    %11 = vector.load %arg7[%c0_13, %c0_14] : memref<1x128xf32, #tpu.memory_space<vmem>>, vector<1x128xf32>
    %12 = vector.broadcast %11 : vector<1x128xf32> to vector<50x128xf32>
    %13 = arith.addf %10, %12 : vector<50x128xf32>
    %14 = arith.negf %13 : vector<50x128xf32>
    %15 = math.exp %14 : vector<50x128xf32>
    %cst_15 = arith.constant 1.000000e+00 : f32
    %16 = vector.broadcast %cst_15 : f32 to vector<50x128xf32>
    %17 = arith.addf %16, %15 : vector<50x128xf32>
    %18 = arith.divf %16, %17 : vector<50x128xf32>
    %19 = arith.mulf %13, %18 : vector<50x128xf32>
    %c0_16 = arith.constant 0 : index
    %c0_17 = arith.constant 0 : index
    %20 = vector.load %arg8[%c0_16, %c0_17] : memref<128x128xf32, #tpu.memory_space<vmem>>, vector<128x128xf32>
    %cst_18 = arith.constant dense<0.000000e+00> : vector<50x128xf32>
    %21 = tpu.matmul %19, %20, %cst_18 {dimension_numbers = #tpu.dot_dimension_numbers<[1], [0], [0], [1], [0, 0, 1, 1], [], []>} : vector<50x128xf32>, vector<128x128xf32>, vector<50x128xf32> -> vector<50x128xf32>
    %c0_19 = arith.constant 0 : index
    %c0_20 = arith.constant 0 : index
    %22 = vector.load %arg9[%c0_19, %c0_20] : memref<1x128xf32, #tpu.memory_space<vmem>>, vector<1x128xf32>
    %23 = vector.broadcast %22 : vector<1x128xf32> to vector<50x128xf32>
    %24 = arith.addf %21, %23 : vector<50x128xf32>
    %25 = arith.negf %24 : vector<50x128xf32>
    %26 = math.exp %25 : vector<50x128xf32>
    %cst_21 = arith.constant 1.000000e+00 : f32
    %27 = vector.broadcast %cst_21 : f32 to vector<50x128xf32>
    %28 = arith.addf %27, %26 : vector<50x128xf32>
    %29 = arith.divf %27, %28 : vector<50x128xf32>
    %30 = arith.mulf %24, %29 : vector<50x128xf32>
    %c0_22 = arith.constant 0 : index
    %c0_23 = arith.constant 0 : index
    %31 = vector.load %arg10[%c0_22, %c0_23] : memref<128x128xf32, #tpu.memory_space<vmem>>, vector<128x128xf32>
    %cst_24 = arith.constant dense<0.000000e+00> : vector<50x128xf32>
    %32 = tpu.matmul %30, %31, %cst_24 {dimension_numbers = #tpu.dot_dimension_numbers<[1], [0], [0], [1], [0, 0, 1, 1], [], []>} : vector<50x128xf32>, vector<128x128xf32>, vector<50x128xf32> -> vector<50x128xf32>
    %c0_25 = arith.constant 0 : index
    %c0_26 = arith.constant 0 : index
    %33 = vector.load %arg11[%c0_25, %c0_26] : memref<1x128xf32, #tpu.memory_space<vmem>>, vector<1x128xf32>
    %34 = vector.broadcast %33 : vector<1x128xf32> to vector<50x128xf32>
    %35 = arith.addf %32, %34 : vector<50x128xf32>
    %c0_27 = arith.constant 0 : index
    %c0_28 = arith.constant 0 : index
    %36 = vector.load %arg12[%c0_27, %c0_28] : memref<50x128xf32, #tpu.memory_space<vmem>>, vector<50x128xf32>
    tpu.vector_store %arg12[%c0_27, %c0_28], %35 {strides = array<i32>} : memref<50x128xf32, #tpu.memory_space<vmem>>, vector<50x128xf32>,
    return
  }
  func.func @transform_0(%arg0: i32) -> (i32, i32) {
    %c0_i32 = arith.constant 0 : i32
    %c0_i32_0 = arith.constant 0 : i32
    return %arg0, %c0_i32 : i32, i32
  }
  func.func @transform_1(%arg0: i32) -> (i32, i32) {
    %c0_i32 = arith.constant 0 : i32
    %c0_i32_0 = arith.constant 0 : i32
    return %arg0, %c0_i32 : i32, i32
  }
  func.func @transform_2(%arg0: i32) -> (i32, i32) {
    %c0_i32 = arith.constant 0 : i32
    %c0_i32_0 = arith.constant 0 : i32
    return %arg0, %c0_i32 : i32, i32
  }
  func.func @transform_3(%arg0: i32) -> (i32, i32) {
    %c0_i32 = arith.constant 0 : i32
    %c0_i32_0 = arith.constant 0 : i32
    %c0_i32_1 = arith.constant 0 : i32
    return %c0_i32, %c0_i32_0 : i32, i32
  }
  func.func @transform_4(%arg0: i32) -> (i32, i32) {
    %c0_i32 = arith.constant 0 : i32
    %c0_i32_0 = arith.constant 0 : i32
    %c0_i32_1 = arith.constant 0 : i32
    return %c0_i32, %c0_i32_0 : i32, i32
  }
  func.func @transform_5(%arg0: i32) -> (i32, i32) {
    %c0_i32 = arith.constant 0 : i32
    %c0_i32_0 = arith.constant 0 : i32
    %c0_i32_1 = arith.constant 0 : i32
    return %c0_i32, %c0_i32_0 : i32, i32
  }
  func.func @transform_6(%arg0: i32) -> (i32, i32) {
    %c0_i32 = arith.constant 0 : i32
    %c0_i32_0 = arith.constant 0 : i32
    %c0_i32_1 = arith.constant 0 : i32
    return %c0_i32, %c0_i32_0 : i32, i32
  }
  func.func @transform_7(%arg0: i32) -> (i32, i32) {
    %c0_i32 = arith.constant 0 : i32
    %c0_i32_0 = arith.constant 0 : i32
    %c0_i32_1 = arith.constant 0 : i32
    return %c0_i32, %c0_i32_0 : i32, i32
  }
  func.func @transform_8(%arg0: i32) -> (i32, i32) {
    %c0_i32 = arith.constant 0 : i32
    %c0_i32_0 = arith.constant 0 : i32
    %c0_i32_1 = arith.constant 0 : i32
    return %c0_i32, %c0_i32_0 : i32, i32
  }
  func.func @transform_9(%arg0: i32) -> (i32, i32) {
    %c0_i32 = arith.constant 0 : i32
    %c0_i32_0 = arith.constant 0 : i32
    %c0_i32_1 = arith.constant 0 : i32
    return %c0_i32, %c0_i32_0 : i32, i32
  }
  func.func @transform_10(%arg0: i32) -> (i32, i32) {
    %c0_i32 = arith.constant 0 : i32
    %c0_i32_0 = arith.constant 0 : i32
    %c0_i32_1 = arith.constant 0 : i32
    return %c0_i32, %c0_i32_0 : i32, i32
  }
  func.func @transform_11(%arg0: i32) -> (i32, i32) {
    %c0_i32 = arith.constant 0 : i32
    %c0_i32_0 = arith.constant 0 : i32
    return %arg0, %c0_i32 : i32, i32
  }
}

</mosaic_0001>

<bundles_post_ra>
// kernel: tpu_custom_call.1
= control target key start
LH: loop header
LB: loop body
LE: loop exit
PB: predicated region body
PF: predicated region fallthrough
CT: control target
= control target key end

     0   :  { %16 = vsyncpa [#allocation3], 0  ;;  %s1902_s0 = inlined_call_operand.hbm [shape: f32[50,128], index: 0, kind: input, shape index: {}]   ;;  %s1903_s1 = inlined_call_operand.hbm [shape: f32[50,128], index: 1, kind: input, shape index: {}]   ;;  %s1904_s2 = inlined_call_operand.hbm [shape: f32[50,128], index: 2, kind: input, shape index: {}]   ;;  %s1905_s3 = inlined_call_operand.hbm [shape: f32[128,128], index: 3, kind: input, shape index: {}]   ;;  %s1906_s4 = inlined_call_operand.hbm [shape: f32[128,128], index: 4, kind: input, shape index: {}]   ;;  %s1907_s5 = inlined_call_operand.hbm [shape: f32[128,128], index: 5, kind: input, shape index: {}]   ;;  %s1908_s6 = inlined_call_operand.vmem [shape: f32[1,128], index: 6, kind: input, shape index: {}]   ;;  %s1909_s7 = inlined_call_operand.hbm [shape: f32[128,128], index: 7, kind: input, shape index: {}]   ;;  %s1910_s8 = inlined_call_operand.vmem [shape: f32[1,128], index: 8, kind: input, shape index: {}]   ;;  %s1911_s9 = inlined_call_operand.hbm [shape: f32[128,128], index: 9, kind: input, shape index: {}]   ;;  %s1912_s10 = inlined_call_operand.vmem [shape: f32[1,128], index: 10, kind: input, shape index: {}]   ;;  %s1913_s11 = inlined_call_operand.hbm [shape: f32[50,128], index: 11, kind: output, shape index: {}]  }
   0x1   :  { %17 = vsyncpa [#allocation6], 0 }
   0x2   :  { %18 = vsyncpa [#allocation9], 0 }
   0x3   :  { %19 = vsyncpa [#allocation12], 0 }
   0x4   :  { %20 = vsyncpa [#allocation15], 0 }
   0x5   :  { %21 = vsyncpa [#allocation4], 0  ;;  %s1600_s17 = smov [#allocation5]   ;;  %s1601_s19 = smov [#allocation8]  }
   0x6   :  { %s39_s18 = sshll.u32 %s1600_s17, 4  ;;  %s63_s20 = sshll.u32 %s1601_s19, 4  ;;  %s40_s18 = int_to_ptr.vmem [resolvable:$true] %s39_s18  ;;  %s64_s20 = int_to_ptr.vmem [resolvable:$true] %s63_s20 }
   0x7   :  { %s1416_s21 = scalar_lea.vmem %s40_s18, 896  ;;  %p1421_p1 = scmp.lt.s32.totalorder %s40_s18, %s40_s18 }
   0x8   :  { %p1417_p0 = scmp.ne.s32.totalorder %s40_s18, %s1416_s21  ;;  %p1422_p2 = scmp.lt.s32.totalorder %s1416_s21, %s1416_s21 }
   0xa   :  { %p1423_p3 = por %p1422_p2, %p1421_p1 }
   0xc   :  { %p1424_p4 = pnand %p1423_p3, %p1417_p0 }
   0xe   :  { %1427 = shalt.err (!%p1424_p4)
}
   0xf   :  { %s1602_s22 = smov 128   ;;  %s1603_s23 = smov 8  }
  0x10   :  { %45 = dma.hbm_to_vmem [thread:$0]  %s1903_s1, 896, %s40_s18, [#allocation6], %s1602_s22, %s1602_s22, %s1603_s23  }
  0x11   :  { %s1436_s26 = scalar_lea.vmem %s64_s20, 2048  ;;  %p1441_p6 = scmp.lt.s32.totalorder %s64_s20, %s64_s20 }
  0x12   :  { %p1437_p5 = scmp.ne.s32.totalorder %s64_s20, %s1436_s26  ;;  %p1442_p7 = scmp.lt.s32.totalorder %s1436_s26, %s1436_s26 }
  0x14   :  { %p1443_p8 = por %p1442_p7, %p1441_p6 }
  0x16   :  { %p1444_p9 = pnand %p1443_p8, %p1437_p5 }
  0x18   :  { %1447 = shalt.err (!%p1444_p9)
}
  0x19   :  { %69 = dma.hbm_to_vmem [thread:$0]  %s1905_s3, 2048, %s64_s20, [#allocation9], %s1602_s22, %s1602_s22, %s1603_s23  }
  0x1a   :  { %s1604_s29 = smov [#allocation11]   ;;  %s1605_s12 = smov [#allocation2]  }
  0x1b   :  { %s87_s30 = sshll.u32 %s1604_s29, 4  ;;  %s27_s13 = sshll.u32 %s1605_s12, 4  ;;  %s88_s30 = int_to_ptr.vmem [resolvable:$true] %s87_s30  ;;  %s28_s13 = int_to_ptr.vmem [resolvable:$true] %s27_s13 }
  0x1c   :  { %s1456_s1 = scalar_lea.vmem %s88_s30, 2048  ;;  %p1461_p11 = scmp.lt.s32.totalorder %s88_s30, %s88_s30 }
  0x1d   :  { %p1457_p10 = scmp.ne.s32.totalorder %s88_s30, %s1456_s1  ;;  %p1462_p12 = scmp.lt.s32.totalorder %s1456_s1, %s1456_s1 }
  0x1f   :  { %p1463_p13 = por %p1462_p12, %p1461_p11 }
  0x21   :  { %p1464_p0 = pnand %p1463_p13, %p1457_p10 }
  0x23   :  { %1467 = shalt.err (!%p1464_p0)
}
  0x24   :  { %93 = dma.hbm_to_vmem [thread:$0]  %s1907_s5, 2048, %s88_s30, [#allocation12], %s1602_s22, %s1602_s22, %s1603_s23  }
  0x25   :  { %s1476_s3 = scalar_lea.vmem %s28_s13, 896  ;;  %p1481_p2 = scmp.lt.s32.totalorder %s28_s13, %s28_s13 }
  0x26   :  { %p1477_p1 = scmp.ne.s32.totalorder %s28_s13, %s1476_s3  ;;  %p1482_p3 = scmp.lt.s32.totalorder %s1476_s3, %s1476_s3 }
  0x28   :  { %p1483_p4 = por %p1482_p3, %p1481_p2 }
  0x2a   :  { %p1484_p5 = pnand %p1483_p4, %p1477_p1 }
  0x2c   :  { %1487 = shalt.err (!%p1484_p5)
}
  0x2d   :  { %33 = dma.hbm_to_vmem [thread:$0]  %s1902_s0, 896, %s28_s13, [#allocation3], %s1602_s22, %s1602_s22, %s1603_s23  }
  0x2e   :  { %s1606_s18 = smov [#allocation7]   ;;  %s1607_s20 = smov [#allocation10]  }
  0x2f   :  { %s51_s19 = sshll.u32 %s1606_s18, 4  ;;  %s75_s21 = sshll.u32 %s1607_s20, 4  ;;  %s52_s19 = int_to_ptr.vmem [resolvable:$true] %s51_s19  ;;  %s76_s21 = int_to_ptr.vmem [resolvable:$true] %s75_s21 }
  0x30   :  { %s1496_s5 = scalar_lea.vmem %s52_s19, 896  ;;  %p1501_p7 = scmp.lt.s32.totalorder %s52_s19, %s52_s19 }
  0x31   :  { %p1497_p6 = scmp.ne.s32.totalorder %s52_s19, %s1496_s5  ;;  %p1502_p8 = scmp.lt.s32.totalorder %s1496_s5, %s1496_s5 }
  0x33   :  { %p1503_p9 = por %p1502_p8, %p1501_p7 }
  0x35   :  { %p1504_p10 = pnand %p1503_p9, %p1497_p6 }
  0x37   :  { %1507 = shalt.err (!%p1504_p10)
}
  0x38   :  { %57 = dma.hbm_to_vmem [thread:$0]  %s1904_s2, 896, %s52_s19, [#allocation6], %s1602_s22, %s1602_s22, %s1603_s23  }
  0x39   :  { %s1516_s0 = scalar_lea.vmem %s76_s21, 2048  ;;  %p1521_p12 = scmp.lt.s32.totalorder %s76_s21, %s76_s21 }
  0x3a   :  { %p1517_p11 = scmp.ne.s32.totalorder %s76_s21, %s1516_s0  ;;  %p1522_p13 = scmp.lt.s32.totalorder %s1516_s0, %s1516_s0 }
  0x3c   :  { %p1523_p0 = por %p1522_p13, %p1521_p12 }
  0x3e   :  { %p1524_p1 = pnand %p1523_p0, %p1517_p11 }
  0x40   :  { %1527 = shalt.err (!%p1524_p1)
}
  0x41   :  { %81 = dma.hbm_to_vmem [thread:$0]  %s1906_s4, 2048, %s76_s21, [#allocation9], %s1602_s22, %s1602_s22, %s1603_s23  }
  0x42   :  { %s1608_s28 = smov [#allocation13]   ;;  %s1609_s30 = smov [#allocation14]  }
  0x43   :  { %s101_s29 = sshll.u32 %s1608_s28, 4  ;;  %s115_s12 = sshll.u32 %s1609_s30, 4  ;;  %s102_s29 = int_to_ptr.vmem [resolvable:$true] %s101_s29  ;;  %s116_s12 = int_to_ptr.vmem [resolvable:$true] %s115_s12 }
  0x44   :  { %s1536_s2 = scalar_lea.vmem %s102_s29, 2048  ;;  %p1541_p3 = scmp.lt.s32.totalorder %s102_s29, %s102_s29 }
  0x45   :  { %p1537_p2 = scmp.ne.s32.totalorder %s102_s29, %s1536_s2  ;;  %p1542_p4 = scmp.lt.s32.totalorder %s1536_s2, %s1536_s2 }
  0x47   :  { %p1543_p5 = por %p1542_p4, %p1541_p3 }
  0x49   :  { %p1544_p6 = pnand %p1543_p5, %p1537_p2 }
  0x4b   :  { %1547 = shalt.err (!%p1544_p6)
}
  0x4c   :  { %107 = dma.hbm_to_vmem [thread:$0]  %s1909_s7, 2048, %s102_s29, [#allocation12], %s1602_s22, %s1602_s22, %s1603_s23  }
  0x4d   :  { %s1556_s4 = scalar_lea.vmem %s116_s12, 2048  ;;  %p1561_p8 = scmp.lt.s32.totalorder %s116_s12, %s116_s12 }
  0x4e   :  { %p1557_p7 = scmp.ne.s32.totalorder %s116_s12, %s1556_s4  ;;  %p1562_p9 = scmp.lt.s32.totalorder %s1556_s4, %s1556_s4 }
  0x50   :  { %p1563_p10 = por %p1562_p9, %p1561_p8 }
  0x52   :  { %p1564_p11 = pnand %p1563_p10, %p1557_p7 }
  0x54   :  { %1567 = shalt.err (!%p1564_p11)
}
  0x55   :  { %121 = dma.hbm_to_vmem [thread:$0]  %s1911_s9, 2048, %s116_s12, [#allocation15], %s1602_s22, %s1602_s22, %s1603_s23  }
  0x56   :  { %1588 = dma.done.wait [#allocation3], 896  }
  0x57   :  { %1589 = vsyncadd [#allocation3], 4294966400 }
  0x58   :  { %1590 = dma.done.wait [#allocation6], 1792  }
  0x59   :  { %1591 = vsyncadd [#allocation6], 4294965504 }
  0x5a   :  { %1592 = dma.done.wait [#allocation9], 4096  }
  0x5b   :  { %1593 = vsyncadd [#allocation9], 4294963200 }
  0x5c   :  { %1594 = dma.done.wait [#allocation12], 4096  }
  0x5d   :  { %1595 = vsyncadd [#allocation12], 4294963200 }
  0x5e   :  { %1596 = dma.done.wait [#allocation15], 2048  }
  0x5f   :  { %1597 = vsyncadd [#allocation15], 4294965248  ;;  %v1610_v0 = vmov 0.0   ;;  %vm1611_vm0 = vmmov 0   ;;  %v193_v1 = vld [vmem:[#allocation10 + $0x78] sm:$0xff]  ;;  %v192_v3 = vld [vmem:[#allocation10 + $0x70] sm:$0xff] }
  0x60   :  { %1042 = vmatprep.subr.mxu0 %v1610_v0  ;;  %1095 = vmatprep.subr.mxu1 %v1610_v0  ;;  %v170_v2 = vld [vmem:[#allocation8 + $0x78] sm:$0xff]  ;;  %v169_v4 = vld [vmem:[#allocation8 + $0x70] sm:$0xff]  ;;  %v191_v5 = vld [vmem:[#allocation10 + $0x68] sm:$0xff] }
  0x61   :  { %1074 = vmatprep.mubr.msk.f32.mxu0 %vm1611_vm0, %v1610_v0  ;;  %1127 = vmatprep.mubr.msk.f32.mxu1 %vm1611_vm0, %v1610_v0  ;;  %v168_v6 = vld [vmem:[#allocation8 + $0x68] sm:$0xff]  ;;  %v190_v7 = vld [vmem:[#allocation10 + $0x60] sm:$0xff]  ;;  %v189_v9 = vld [vmem:[#allocation10 + $0x58] sm:$0xff] }
  0x62   :  { %1043 = vmatpush3.msra.mxu0 %v193_v1  ;;  %1096 = vmatpush3.msra.mxu1 %v170_v2  ;;  %v167_v8 = vld [vmem:[#allocation8 + $0x60] sm:$0xff]  ;;  %v166_v10 = vld [vmem:[#allocation8 + $0x58] sm:$0xff]  ;;  %v188_v11 = vld [vmem:[#allocation10 + $0x50] sm:$0xff] }
  0x63   :  { %1044 = vmatprep.subr.mxu0 %v1610_v0  ;;  %1097 = vmatprep.subr.mxu1 %v1610_v0  ;;  %v165_v12 = vld [vmem:[#allocation8 + $0x50] sm:$0xff]  ;;  %v187_v13 = vld [vmem:[#allocation10 + $0x48] sm:$0xff]  ;;  %v186_v15 = vld [vmem:[#allocation10 + $0x40] sm:$0xff] }
  0x64   :  { %1045 = vmatpush3.msra.mxu0 %v192_v3  ;;  %1098 = vmatpush3.msra.mxu1 %v169_v4  ;;  %v164_v14 = vld [vmem:[#allocation8 + $0x48] sm:$0xff]  ;;  %v163_v16 = vld [vmem:[#allocation8 + $0x40] sm:$0xff]  ;;  %v185_v17 = vld [vmem:[#allocation10 + $0x38] sm:$0xff] }
  0x65   :  { %1046 = vmatprep.subr.mxu0 %v1610_v0  ;;  %1099 = vmatprep.subr.mxu1 %v1610_v0  ;;  %v162_v18 = vld [vmem:[#allocation8 + $0x38] sm:$0xff]  ;;  %v184_v19 = vld [vmem:[#allocation10 + $0x30] sm:$0xff]  ;;  %v183_v21 = vld [vmem:[#allocation10 + $0x28] sm:$0xff] }
  0x66   :  { %1047 = vmatpush3.msra.mxu0 %v191_v5  ;;  %1100 = vmatpush3.msra.mxu1 %v168_v6  ;;  %v161_v20 = vld [vmem:[#allocation8 + $0x30] sm:$0xff]  ;;  %v160_v22 = vld [vmem:[#allocation8 + $0x28] sm:$0xff]  ;;  %v182_v23 = vld [vmem:[#allocation10 + $0x20] sm:$0xff] }
  0x67   :  { %1048 = vmatprep.subr.mxu0 %v1610_v0  ;;  %1101 = vmatprep.subr.mxu1 %v1610_v0  ;;  %v159_v24 = vld [vmem:[#allocation8 + $0x20] sm:$0xff]  ;;  %v181_v25 = vld [vmem:[#allocation10 + $0x18] sm:$0xff]  ;;  %v180_v27 = vld [vmem:[#allocation10 + $0x10] sm:$0xff] }
  0x68   :  { %1049 = vmatpush3.msra.mxu0 %v190_v7  ;;  %1102 = vmatpush3.msra.mxu1 %v167_v8  ;;  %v158_v26 = vld [vmem:[#allocation8 + $0x18] sm:$0xff]  ;;  %v157_v28 = vld [vmem:[#allocation8 + $0x10] sm:$0xff]  ;;  %v179_v29 = vld [vmem:[#allocation10 + $0x8] sm:$0xff] }
  0x69   :  { %1050 = vmatprep.subr.mxu0 %v1610_v0  ;;  %1103 = vmatprep.subr.mxu1 %v1610_v0  ;;  %v156_v30 = vld [vmem:[#allocation8 + $0x8] sm:$0xff]  ;;  %v178_v31 = vld [vmem:[#allocation10] sm:$0xff]  ;;  %v171_v33 = vld [vmem:[#allocation5] sm:$0xff] }
  0x6a   :  { %1051 = vmatpush3.msra.mxu0 %v189_v9  ;;  %1104 = vmatpush3.msra.mxu1 %v166_v10  ;;  %v155_v32 = vld [vmem:[#allocation8] sm:$0xff]  ;;  %v148_v34 = vld [vmem:[#allocation2] sm:$0xff]  ;;  %v415_v36 = vld [vmem:[#allocation11 + $0x70] sm:$0xff] }
  0x6b   :  { %1052 = vmatprep.subr.mxu0 %v1610_v0  ;;  %1105 = vmatprep.subr.mxu1 %v1610_v0  ;;  %v416_v35 = vld [vmem:[#allocation11 + $0x78] sm:$0xff]  ;;  %v414_v38 = vld [vmem:[#allocation11 + $0x68] sm:$0xff]  ;;  %v149_v39 = vld [vmem:[#allocation2 + $0x8] sm:$0xff] }
  0x6c   :  { %1053 = vmatpush3.msra.mxu0 %v188_v11  ;;  %1106 = vmatpush3.msra.mxu1 %v165_v12  ;;  %v172_v37 = vld [vmem:[#allocation5 + $0x8] sm:$0xff]  ;;  %v413_v40 = vld [vmem:[#allocation11 + $0x60] sm:$0xff]  ;;  %v150_v43 = vld [vmem:[#allocation2 + $0x10] sm:$0xff] }
  0x6d   :  { %1054 = vmatprep.subr.mxu0 %v1610_v0  ;;  %1107 = vmatprep.subr.mxu1 %v1610_v0  ;;  %v173_v41 = vld [vmem:[#allocation5 + $0x10] sm:$0xff]  ;;  %v412_v42 = vld [vmem:[#allocation11 + $0x58] sm:$0xff]  ;;  %v411_v44 = vld [vmem:[#allocation11 + $0x50] sm:$0xff] }
  0x6e   :  { %1055 = vmatpush3.msra.mxu0 %v187_v13  ;;  %1108 = vmatpush3.msra.mxu1 %v164_v14  ;;  %v174_v45 = vld [vmem:[#allocation5 + $0x18] sm:$0xff]  ;;  %v151_v47 = vld [vmem:[#allocation2 + $0x18] sm:$0xff]  ;;  %v409_v48 = vld [vmem:[#allocation11 + $0x40] sm:$0xff] }
  0x6f   :  { %1056 = vmatprep.subr.mxu0 %v1610_v0  ;;  %1109 = vmatprep.subr.mxu1 %v1610_v0  ;;  %v410_v46 = vld [vmem:[#allocation11 + $0x48] sm:$0xff]  ;;  %v175_v49 = vld [vmem:[#allocation5 + $0x20] sm:$0xff]  ;;  %v408_v50 = vld [vmem:[#allocation11 + $0x38] sm:$0xff] }
  0x70   :  { %1057 = vmatpush3.msra.mxu0 %v186_v15  ;;  %1110 = vmatpush3.msra.mxu1 %v163_v16  ;;  %v152_v51 = vld [vmem:[#allocation2 + $0x20] sm:$0xff]  ;;  %v407_v52 = vld [vmem:[#allocation11 + $0x30] sm:$0xff]  ;;  %v406_v54 = vld [vmem:[#allocation11 + $0x28] sm:$0xff] }
  0x71   :  { %1058 = vmatprep.subr.mxu0 %v1610_v0  ;;  %1111 = vmatprep.subr.mxu1 %v1610_v0  ;;  %v176_v53 = vld [vmem:[#allocation5 + $0x28] sm:$0xff]  ;;  %v153_v55 = vld [vmem:[#allocation2 + $0x28] sm:$0xff]  ;;  %v154_v59 = vld [vmem:[#allocation2 + $0x30] sm:$0x3] }
  0x72   :  { %1059 = vmatpush3.msra.mxu0 %v185_v17  ;;  %1112 = vmatpush3.msra.mxu1 %v162_v18  ;;  %v405_v56 = vld [vmem:[#allocation11 + $0x20] sm:$0xff]  ;;  %v404_v58 = vld [vmem:[#allocation11 + $0x18] sm:$0xff]  ;;  %v403_v60 = vld [vmem:[#allocation11 + $0x10] sm:$0xff] }
  0x73   :  { %1060 = vmatprep.subr.mxu0 %v1610_v0  ;;  %1113 = vmatprep.subr.mxu1 %v1610_v0  ;;  %v177_v57 = vld [vmem:[#allocation5 + $0x30] sm:$0x3]  ;;  %v402_v61 = vld [vmem:[#allocation11 + $0x8] sm:$0xff]  ;;  %v395_v1 = vld [vmem:[#allocation7 + $0x8] sm:$0xff] }
  0x74   :  { %1061 = vmatpush3.msra.mxu0 %v184_v19  ;;  %1114 = vmatpush3.msra.mxu1 %v161_v20  ;;  %v401_v62 = vld [vmem:[#allocation11] sm:$0xff]  ;;  %v394_v63 = vld [vmem:[#allocation7] sm:$0xff]  ;;  %v396_v2 = vld [vmem:[#allocation7 + $0x10] sm:$0xff] }
  0x75   :  { %1062 = vmatprep.subr.mxu0 %v1610_v0  ;;  %1115 = vmatprep.subr.mxu1 %v1610_v0  ;;  %v397_v3 = vld [vmem:[#allocation7 + $0x18] sm:$0xff]  ;;  %v398_v4 = vld [vmem:[#allocation7 + $0x20] sm:$0xff]  ;;  %v399_v5 = vld [vmem:[#allocation7 + $0x28] sm:$0xff] }
  0x76   :  { %1063 = vmatpush3.msra.mxu0 %v183_v21  ;;  %1116 = vmatpush3.msra.mxu1 %v160_v22  ;;  %v400_v6 = vld [vmem:[#allocation7 + $0x30] sm:$0x3]  ;;  %v601_v8 = vld [vmem:[#allocation13 + $0x70] sm:$0xff]  ;;  %v600_v9 = vld [vmem:[#allocation13 + $0x68] sm:$0xff] }
  0x77   :  { %1064 = vmatprep.subr.mxu0 %v1610_v0  ;;  %1117 = vmatprep.subr.mxu1 %v1610_v0  ;;  %v602_v7 = vld [vmem:[#allocation13 + $0x78] sm:$0xff]  ;;  %v599_v10 = vld [vmem:[#allocation13 + $0x60] sm:$0xff]  ;;  %v597_v12 = vld [vmem:[#allocation13 + $0x50] sm:$0xff] }
  0x78   :  { %1065 = vmatpush3.msra.mxu0 %v182_v23  ;;  %1118 = vmatpush3.msra.mxu1 %v159_v24  ;;  %v598_v11 = vld [vmem:[#allocation13 + $0x58] sm:$0xff]  ;;  %v596_v13 = vld [vmem:[#allocation13 + $0x48] sm:$0xff]  ;;  %v595_v14 = vld [vmem:[#allocation13 + $0x40] sm:$0xff] }
  0x79   :  { %1066 = vmatprep.subr.mxu0 %v1610_v0  ;;  %1119 = vmatprep.subr.mxu1 %v1610_v0  ;;  %v594_v15 = vld [vmem:[#allocation13 + $0x38] sm:$0xff]  ;;  %v593_v16 = vld [vmem:[#allocation13 + $0x30] sm:$0xff]  ;;  %v592_v17 = vld [vmem:[#allocation13 + $0x28] sm:$0xff] }
  0x7a   :  { %1067 = vmatpush3.msra.mxu0 %v181_v25  ;;  %1120 = vmatpush3.msra.mxu1 %v158_v26  ;;  %v591_v18 = vld [vmem:[#allocation13 + $0x20] sm:$0xff]  ;;  %v590_v19 = vld [vmem:[#allocation13 + $0x18] sm:$0xff]  ;;  %v589_v20 = vld [vmem:[#allocation13 + $0x10] sm:$0xff] }
  0x7b   :  { %1068 = vmatprep.subr.mxu0 %v1610_v0  ;;  %1121 = vmatprep.subr.mxu1 %v1610_v0  ;;  %v588_v21 = vld [vmem:[#allocation13 + $0x8] sm:$0xff]  ;;  %v587_v22 = vld [vmem:[#allocation13] sm:$0xff] }
  0x7c   :  { %1069 = vmatpush3.msra.mxu0 %v180_v27  ;;  %1122 = vmatpush3.msra.mxu1 %v157_v28 }
  0x7d   :  { %1070 = vmatprep.subr.mxu0 %v1610_v0  ;;  %1123 = vmatprep.subr.mxu1 %v1610_v0 }
  0x7e   :  { %1071 = vmatpush3.msra.mxu0 %v179_v29  ;;  %1124 = vmatpush3.msra.mxu1 %v156_v30 }
  0x7f   :  { %1072 = vmatprep.subr.mxu0 %v1610_v0  ;;  %1125 = vmatprep.subr.mxu1 %v1610_v0 }
  0x80   :  { %1073 = vmatpush3.msra.mxu0 %v178_v31  ;;  %1126 = vmatpush3.msra.mxu1 %v155_v32 }
  0x81   :  { %1075 = vmatmul.mubr.f32.vlgmr.msra.gmra.mxu0 %v171_v33  ;;  %1148 = vmatprep.subr.mxu0 %v1610_v0 }
  0x82   :  { %1128 = vmatmul.mubr.f32.vlgmr.msra.gmra.mxu1 %v148_v34  ;;  %1149 = vmatpush3.msra.mxu0 %v416_v35 }
  0x83   :  { %1150 = vmatprep.subr.mxu0 %v1610_v0  ;;  %1077 = vmatprep.mubr.msk.f32.mxu0 %vm1611_vm0, %v1610_v0 }
  0x84   :  { %1151 = vmatpush3.msra.mxu0 %v415_v36  ;;  %1130 = vmatprep.mubr.msk.f32.mxu1 %vm1611_vm0, %v1610_v0 }
  0x85   :  { %1152 = vmatprep.subr.mxu0 %v1610_v0  ;;  %1078 = vmatmul.mubr.f32.gmra.mxu0 %v172_v37 }
  0x86   :  { %1153 = vmatpush3.msra.mxu0 %v414_v38  ;;  %1131 = vmatmul.mubr.f32.gmra.mxu1 %v149_v39 }
  0x87   :  { %1154 = vmatprep.subr.mxu0 %v1610_v0  ;;  %1080 = vmatprep.mubr.msk.f32.mxu0 %vm1611_vm0, %v1610_v0 }
  0x88   :  { %1155 = vmatpush3.msra.mxu0 %v413_v40  ;;  %1133 = vmatprep.mubr.msk.f32.mxu1 %vm1611_vm0, %v1610_v0 }
  0x89   :  { %1156 = vmatprep.subr.mxu0 %v1610_v0  ;;  %1081 = vmatmul.mubr.f32.gmra.mxu0 %v173_v41 }
  0x8a   :  { %1157 = vmatpush3.msra.mxu0 %v412_v42  ;;  %1134 = vmatmul.mubr.f32.gmra.mxu1 %v150_v43 }
  0x8b   :  { %1158 = vmatprep.subr.mxu0 %v1610_v0  ;;  %1083 = vmatprep.mubr.msk.f32.mxu0 %vm1611_vm0, %v1610_v0 }
  0x8c   :  { %1159 = vmatpush3.msra.mxu0 %v411_v44  ;;  %1136 = vmatprep.mubr.msk.f32.mxu1 %vm1611_vm0, %v1610_v0 }
  0x8d   :  { %1160 = vmatprep.subr.mxu0 %v1610_v0  ;;  %1084 = vmatmul.mubr.f32.gmra.mxu0 %v174_v45 }
  0x8e   :  { %1161 = vmatpush3.msra.mxu0 %v410_v46  ;;  %1137 = vmatmul.mubr.f32.gmra.mxu1 %v151_v47 }
  0x8f   :  { %1162 = vmatprep.subr.mxu0 %v1610_v0  ;;  %1086 = vmatprep.mubr.msk.f32.mxu0 %vm1611_vm0, %v1610_v0 }
  0x90   :  { %1163 = vmatpush3.msra.mxu0 %v409_v48  ;;  %1139 = vmatprep.mubr.msk.f32.mxu1 %vm1611_vm0, %v1610_v0 }
  0x91   :  { %1164 = vmatprep.subr.mxu0 %v1610_v0  ;;  %1087 = vmatmul.mubr.f32.gmra.mxu0 %v175_v49 }
  0x92   :  { %1165 = vmatpush3.msra.mxu0 %v408_v50  ;;  %1140 = vmatmul.mubr.f32.gmra.mxu1 %v152_v51 }
  0x93   :  { %1166 = vmatprep.subr.mxu0 %v1610_v0  ;;  %1089 = vmatprep.mubr.msk.f32.mxu0 %vm1611_vm0, %v1610_v0 }
  0x94   :  { %1167 = vmatpush3.msra.mxu0 %v407_v52  ;;  %1142 = vmatprep.mubr.msk.f32.mxu1 %vm1611_vm0, %v1610_v0 }
  0x95   :  { %1168 = vmatprep.subr.mxu0 %v1610_v0  ;;  %1090 = vmatmul.mubr.f32.gmra.mxu0 %v176_v53  ;;  %v910_v53 = vld [vmem:[%s1908_s6] ss:$0 sm:$0xff] }
  0x96   :  { %1169 = vmatpush3.msra.mxu0 %v406_v54  ;;  %1143 = vmatmul.mubr.f32.gmra.mxu1 %v153_v55 }
  0x97   :  { %1170 = vmatprep.subr.mxu0 %v1610_v0  ;;  %1092 = vmatprep.mubr.msk.f32.mxu0 %vm1611_vm0, %v1610_v0 }
  0x98   :  { %1171 = vmatpush3.msra.mxu0 %v405_v56  ;;  %1145 = vmatprep.mubr.msk.f32.mxu1 %vm1611_vm0, %v1610_v0 }
  0x99   :  { %1172 = vmatprep.subr.mxu0 %v1610_v0  ;;  %1093 = vmatmul.mubr.f32.gmra.mxu0 %v177_v57 }
  0x9a   :  { %1173 = vmatpush3.msra.mxu0 %v404_v58  ;;  %1146 = vmatmul.mubr.f32.gmra.mxu1 %v154_v59 }
  0x9b   :  { %1174 = vmatprep.subr.mxu0 %v1610_v0  ;;  %1180 = vmatprep.mubr.msk.f32.mxu0 %vm1611_vm0, %v1610_v0 }
  0x9c   :  { %1175 = vmatpush3.msra.mxu0 %v403_v60  ;;  %1201 = vmatprep.subr.mxu1 %v1610_v0 }
  0x9d   :  { %1176 = vmatprep.subr.mxu0 %v1610_v0  ;;  %1233 = vmatprep.mubr.msk.f32.mxu1 %vm1611_vm0, %v1610_v0 }
  0x9e   :  { %1177 = vmatpush3.msra.mxu0 %v402_v61  ;;  %1202 = vmatpush3.msra.mxu1 %v602_v7 }
  0x9f   :  { %1178 = vmatprep.subr.mxu0 %v1610_v0  ;;  %1203 = vmatprep.subr.mxu1 %v1610_v0 }
  0xa0   :  { %1179 = vmatpush3.msra.mxu0 %v401_v62  ;;  %1204 = vmatpush3.msra.mxu1 %v601_v8 }
  0xa1   :  { %1181 = vmatmul.mubr.f32.vlgmr.msra.gmra.mxu0 %v394_v63  ;;  %1254 = vmatprep.subr.mxu0 %v1610_v0 }
  0xa2   :  { %1183 = vmatprep.mubr.msk.f32.mxu0 %vm1611_vm0, %v1610_v0  ;;  %1205 = vmatprep.subr.mxu1 %v1610_v0 }
  0xa3   :  { %1206 = vmatpush3.msra.mxu1 %v600_v9 }
  0xa4   :  { %1207 = vmatprep.subr.mxu1 %v1610_v0 }
  0xa5   :  { %1184 = vmatmul.mubr.f32.gmra.mxu0 %v395_v1  ;;  %1208 = vmatpush3.msra.mxu1 %v599_v10 }
  0xa6   :  { %1186 = vmatprep.mubr.msk.f32.mxu0 %vm1611_vm0, %v1610_v0  ;;  %1209 = vmatprep.subr.mxu1 %v1610_v0 }
  0xa7   :  { %1210 = vmatpush3.msra.mxu1 %v598_v11 }
  0xa8   :  { %1211 = vmatprep.subr.mxu1 %v1610_v0 }
  0xa9   :  { %1187 = vmatmul.mubr.f32.gmra.mxu0 %v396_v2  ;;  %1212 = vmatpush3.msra.mxu1 %v597_v12 }
  0xaa   :  { %1189 = vmatprep.mubr.msk.f32.mxu0 %vm1611_vm0, %v1610_v0  ;;  %1213 = vmatprep.subr.mxu1 %v1610_v0 }
  0xab   :  { %1214 = vmatpush3.msra.mxu1 %v596_v13 }
  0xac   :  { %1215 = vmatprep.subr.mxu1 %v1610_v0 }
  0xad   :  { %1190 = vmatmul.mubr.f32.gmra.mxu0 %v397_v3  ;;  %1216 = vmatpush3.msra.mxu1 %v595_v14 }
  0xae   :  { %1192 = vmatprep.mubr.msk.f32.mxu0 %vm1611_vm0, %v1610_v0  ;;  %1217 = vmatprep.subr.mxu1 %v1610_v0 }
  0xaf   :  { %1218 = vmatpush3.msra.mxu1 %v594_v15 }
  0xb0   :  { %1219 = vmatprep.subr.mxu1 %v1610_v0 }
  0xb1   :  { %1193 = vmatmul.mubr.f32.gmra.mxu0 %v398_v4  ;;  %1220 = vmatpush3.msra.mxu1 %v593_v16 }
  0xb2   :  { %1195 = vmatprep.mubr.msk.f32.mxu0 %vm1611_vm0, %v1610_v0  ;;  %1221 = vmatprep.subr.mxu1 %v1610_v0 }
  0xb3   :  { %1222 = vmatpush3.msra.mxu1 %v592_v17 }
  0xb4   :  { %1223 = vmatprep.subr.mxu1 %v1610_v0 }
  0xb5   :  { %1196 = vmatmul.mubr.f32.gmra.mxu0 %v399_v5  ;;  %1224 = vmatpush3.msra.mxu1 %v591_v18 }
  0xb6   :  { %1198 = vmatprep.mubr.msk.f32.mxu0 %vm1611_vm0, %v1610_v0  ;;  %1225 = vmatprep.subr.mxu1 %v1610_v0 }
  0xb7   :  { %1226 = vmatpush3.msra.mxu1 %v590_v19 }
  0xb8   :  { %1227 = vmatprep.subr.mxu1 %v1610_v0 }
  0xb9   :  { %1199 = vmatmul.mubr.f32.gmra.mxu0 %v400_v6  ;;  %1228 = vmatpush3.msra.mxu1 %v589_v20 }
  0xba   :  { %1286 = vmatprep.mubr.msk.f32.mxu0 %vm1611_vm0, %v1610_v0  ;;  %1229 = vmatprep.subr.mxu1 %v1610_v0 }
  0xbb   :  { %1230 = vmatpush3.msra.mxu1 %v588_v21 }
  0xbc   :  { %1231 = vmatprep.subr.mxu1 %v1610_v0 }
  0xbd   :  { %1232 = vmatpush3.msra.mxu1 %v587_v22 }
  0xbe   :  { %1307 = vmatprep.subr.mxu1 %v1610_v0 }
 0x141   :  { %v260_v23 = vpop.f32.mrf.mxu0 }
 0x142   :  { %v360_v24 = vpop.f32.mrf.mxu1 }
 0x143   :  { %v1076_v25 = vpop.f32.mrf.mxu0  ;;  %v361_v51 = vadd.f32 %v360_v24, %v260_v23 }
 0x144   :  { %v1129_v26 = vpop.f32.mrf.mxu1 }
 0x145   :  { %v265_v27 = vpop.f32.mrf.mxu0 }
 0x146   :  { %v365_v28 = vpop.f32.mrf.mxu1 }
 0x147   :  { %v1079_v29 = vpop.f32.mrf.mxu0  ;;  %v366_v56 = vadd.f32 %v365_v28, %v265_v27 }
 0x148   :  { %v1132_v30 = vpop.f32.mrf.mxu1 }
 0x149   :  { %v270_v31 = vpop.f32.mrf.mxu0 }
 0x14a   :  { %v370_v32 = vpop.f32.mrf.mxu1 }
 0x14b   :  { %v1082_v33 = vpop.f32.mrf.mxu0  ;;  %v371_v62 = vadd.f32 %v370_v32, %v270_v31 }
 0x14c   :  { %v1135_v34 = vpop.f32.mrf.mxu1 }
 0x14d   :  { %v275_v35 = vpop.f32.mrf.mxu0 }
 0x14e   :  { %v375_v36 = vpop.f32.mrf.mxu1 }
 0x14f   :  { %v1085_v37 = vpop.f32.mrf.mxu0  ;;  %v376_v5 = vadd.f32 %v375_v36, %v275_v35 }
 0x150   :  { %v1138_v38 = vpop.f32.mrf.mxu1 }
 0x151   :  { %v280_v39 = vpop.f32.mrf.mxu0 }
 0x152   :  { %v380_v40 = vpop.f32.mrf.mxu1 }
 0x153   :  { %v1088_v41 = vpop.f32.mrf.mxu0  ;;  %v381_v11 = vadd.f32 %v380_v40, %v280_v39 }
 0x154   :  { %v1141_v42 = vpop.f32.mrf.mxu1 }
 0x155   :  { %v285_v43 = vpop.f32.mrf.mxu0 }
 0x156   :  { %v385_v44 = vpop.f32.mrf.mxu1 }
 0x157   :  { %v1091_v45 = vpop.f32.mrf.mxu0  ;;  %v386_v17 = vadd.f32 %v385_v44, %v285_v43 }
 0x158   :  { %v1144_v46 = vpop.f32.mrf.mxu1 }
 0x159   :  { %v290_v47 = vpop.f32.mrf.mxu0 }
 0x15a   :  { %v390_v48 = vpop.f32.mrf.mxu1 }
 0x15b   :  { %v1094_v49 = vpop.f32.mrf.mxu0  ;;  %v391_v25 = vadd.f32 %v390_v48, %v290_v47 }
 0x15c   :  { %v1147_v50 = vpop.f32.mrf.mxu1 }
 0x161   :  { %v483_v52 = vpop.f32.mrf.mxu0 }
 0x162   :  { %v517_v54 = vadd.f32 %v483_v52, %v361_v51 }
 0x163   :  { %v1182_v55 = vpop.f32.mrf.mxu0 }
 0x164   :  { %v531_v57 = vadd.f32 %v910_v53, %v517_v54 }
 0x165   :  { %v488_v58 = vpop.f32.mrf.mxu0 }
 0x166   :  { %v911_v59 = vmul.f32 -1.442695, %v531_v57  ;;  %v518_v60 = vadd.f32 %v488_v58, %v366_v56 }
 0x167   :  { %v1185_v61 = vpop.f32.mrf.mxu0 }
 0x168   :  { %1352 = vpow2.f32 %v911_v59  ;;  %v532_v63 = vadd.f32 %v910_v53, %v518_v60  ;;  %v774_v59 = vld [vmem:[#allocation14 + $0x78] sm:$0xff]  ;;  %v773_v60 = vld [vmem:[#allocation14 + $0x70] sm:$0xff]  ;;  %v772_v61 = vld [vmem:[#allocation14 + $0x68] sm:$0xff] }
 0x169   :  { %v493_v1 = vpop.f32.mrf.mxu0  ;;  %1255 = vmatpush3.msra.mxu0 %v774_v59 }
 0x16a   :  { %v912_v2 = vmul.f32 -1.442695, %v532_v63  ;;  %v519_v3 = vadd.f32 %v493_v1, %v371_v62  ;;  %1256 = vmatprep.subr.mxu0 %v1610_v0  ;;  %v771_v62 = vld [vmem:[#allocation14 + $0x60] sm:$0xff]  ;;  %v769_v1 = vld [vmem:[#allocation14 + $0x50] sm:$0xff] }
 0x16b   :  { %v1188_v4 = vpop.f32.mrf.mxu0  ;;  %1257 = vmatpush3.msra.mxu0 %v773_v60 }
 0x16c   :  { %1354 = vpow2.f32 %v912_v2  ;;  %v533_v6 = vadd.f32 %v910_v53, %v519_v3  ;;  %1258 = vmatprep.subr.mxu0 %v1610_v0  ;;  %v768_v2 = vld [vmem:[#allocation14 + $0x48] sm:$0xff]  ;;  %v767_v3 = vld [vmem:[#allocation14 + $0x40] sm:$0xff]  ;;  %v766_v4 = vld [vmem:[#allocation14 + $0x38] sm:$0xff] }
 0x16d   :  { %v498_v7 = vpop.f32.mrf.mxu0  ;;  %1259 = vmatpush3.msra.mxu0 %v772_v61 }
 0x16e   :  { %v913_v8 = vmul.f32 -1.442695, %v533_v6  ;;  %v520_v9 = vadd.f32 %v498_v7, %v376_v5  ;;  %1260 = vmatprep.subr.mxu0 %v1610_v0  ;;  %v765_v5 = vld [vmem:[#allocation14 + $0x30] sm:$0xff]  ;;  %v763_v7 = vld [vmem:[#allocation14 + $0x20] sm:$0xff] }
 0x16f   :  { %v1191_v10 = vpop.f32.mrf.mxu0  ;;  %1261 = vmatpush3.msra.mxu0 %v771_v62 }
 0x170   :  { %1356 = vpow2.f32 %v913_v8  ;;  %v534_v12 = vadd.f32 %v910_v53, %v520_v9  ;;  %1262 = vmatprep.subr.mxu0 %v1610_v0  ;;  %v762_v8 = vld [vmem:[#allocation14 + $0x18] sm:$0xff]  ;;  %v761_v9 = vld [vmem:[#allocation14 + $0x10] sm:$0xff]  ;;  %v760_v10 = vld [vmem:[#allocation14 + $0x8] sm:$0xff] }
 0x171   :  { %v503_v13 = vpop.f32.mrf.mxu0 }
 0x172   :  { %v914_v14 = vmul.f32 -1.442695, %v534_v12  ;;  %v521_v15 = vadd.f32 %v503_v13, %v381_v11  ;;  %v759_v11 = vld [vmem:[#allocation14] sm:$0xff] }
 0x173   :  { %v1194_v16 = vpop.f32.mrf.mxu0 }
 0x174   :  { %1358 = vpow2.f32 %v914_v14  ;;  %v535_v18 = vadd.f32 %v910_v53, %v521_v15 }
 0x175   :  { %v1353_v19 = vpop.eup %1352  ;;  %v508_v20 = vpop.f32.mrf.mxu0 }
 0x176   :  { %v559_v21 = vadd.f32 1.0, %v1353_v19  ;;  %v915_v22 = vmul.f32 -1.442695, %v535_v18  ;;  %v522_v23 = vadd.f32 %v508_v20, %v386_v17 }
 0x177   :  { %v1197_v24 = vpop.f32.mrf.mxu0 }
 0x178   :  { %1360 = vrcp.f32 %v559_v21  ;;  %v536_v26 = vadd.f32 %v910_v53, %v522_v23 }
 0x179   :  { %v1355_v27 = vpop.eup %1354  ;;  %1362 = vpow2.f32 %v915_v22  ;;  %v513_v28 = vpop.f32.mrf.mxu0 }
 0x17a   :  { %v560_v29 = vadd.f32 1.0, %v1355_v27  ;;  %v916_v30 = vmul.f32 -1.442695, %v536_v26  ;;  %v523_v31 = vadd.f32 %v513_v28, %v391_v25 }
 0x17b   :  { %v1200_v32 = vpop.f32.mrf.mxu0 }
 0x17c   :  { %1364 = vrcp.f32 %v560_v29  ;;  %v537_v33 = vadd.f32 %v910_v53, %v523_v31 }
 0x17d   :  { %v1357_v34 = vpop.eup %1356  ;;  %1366 = vpow2.f32 %v916_v30 }
 0x17e   :  { %v561_v35 = vadd.f32 1.0, %v1357_v34  ;;  %v917_v36 = vmul.f32 -1.442695, %v537_v33 }
 0x180   :  { %1368 = vrcp.f32 %v561_v35 }
 0x181   :  { %v1359_v37 = vpop.eup %1358  ;;  %1370 = vpow2.f32 %v917_v36 }
 0x182   :  { %v562_v38 = vadd.f32 1.0, %v1359_v37 }
 0x184   :  { %1372 = vrcp.f32 %v562_v38 }
 0x185   :  { %v1361_v39 = vpop.eup %1360 }
 0x186   :  { %v1363_v40 = vpop.eup %1362  ;;  %v580_v41 = vmul.f32 %v1361_v39, %v531_v57 }
 0x187   :  { %v563_v42 = vadd.f32 1.0, %v1363_v40 }
 0x188   :  { %1234 = vmatmul.mubr.f32.vlgmr.msra.gmra.mxu1 %v580_v41 }
 0x189   :  { %v1365_v43 = vpop.eup %1364  ;;  %1374 = vrcp.f32 %v563_v42  ;;  %1236 = vmatprep.mubr.msk.f32.mxu1 %vm1611_vm0, %v1610_v0  ;;  %1323 = vmatpush3.msra.mxu1 %v774_v59 }
 0x18a   :  { %v1367_v44 = vpop.eup %1366  ;;  %v581_v45 = vmul.f32 %v1365_v43, %v532_v63  ;;  %1308 = vmatprep.subr.mxu1 %v1610_v0  ;;  %v770_v63 = vld [vmem:[#allocation14 + $0x58] sm:$0xff] }
 0x18b   :  { %v564_v46 = vadd.f32 1.0, %v1367_v44  ;;  %1324 = vmatpush3.msra.mxu1 %v773_v60  ;;  %1263 = vmatpush3.msra.mxu0 %v770_v63 }
 0x18c   :  { %1237 = vmatmul.mubr.f32.gmra.mxu1 %v581_v45  ;;  %1309 = vmatprep.subr.mxu1 %v1610_v0 }
 0x18d   :  { %v1369_v47 = vpop.eup %1368  ;;  %1376 = vrcp.f32 %v564_v46  ;;  %1239 = vmatprep.mubr.msk.f32.mxu1 %vm1611_vm0, %v1610_v0  ;;  %1325 = vmatpush3.msra.mxu1 %v772_v61 }
 0x18e   :  { %v1371_v48 = vpop.eup %1370  ;;  %v582_v49 = vmul.f32 %v1369_v47, %v533_v6  ;;  %1310 = vmatprep.subr.mxu1 %v1610_v0  ;;  %1264 = vmatprep.subr.mxu0 %v1610_v0  ;;  %v764_v6 = vld [vmem:[#allocation14 + $0x28] sm:$0xff] }
 0x18f   :  { %v565_v50 = vadd.f32 1.0, %v1371_v48  ;;  %1326 = vmatpush3.msra.mxu1 %v771_v62  ;;  %1265 = vmatpush3.msra.mxu0 %v769_v1 }
 0x190   :  { %1240 = vmatmul.mubr.f32.gmra.mxu1 %v582_v49  ;;  %1311 = vmatprep.subr.mxu1 %v1610_v0 }
 0x191   :  { %v1373_v51 = vpop.eup %1372  ;;  %1378 = vrcp.f32 %v565_v50  ;;  %1242 = vmatprep.mubr.msk.f32.mxu1 %vm1611_vm0, %v1610_v0  ;;  %1327 = vmatpush3.msra.mxu1 %v770_v63 }
 0x192   :  { %v583_v52 = vmul.f32 %v1373_v51, %v534_v12  ;;  %1312 = vmatprep.subr.mxu1 %v1610_v0  ;;  %1266 = vmatprep.subr.mxu0 %v1610_v0  ;;  %v918_v12 = vld [vmem:[%s1910_s8] ss:$0 sm:$0xff] }
 0x193   :  { %1328 = vmatpush3.msra.mxu1 %v769_v1  ;;  %1267 = vmatpush3.msra.mxu0 %v768_v2 }
 0x194   :  { %1243 = vmatmul.mubr.f32.gmra.mxu1 %v583_v52  ;;  %1313 = vmatprep.subr.mxu1 %v1610_v0 }
 0x195   :  { %1245 = vmatprep.mubr.msk.f32.mxu1 %vm1611_vm0, %v1610_v0  ;;  %1329 = vmatpush3.msra.mxu1 %v768_v2 }
 0x196   :  { %v1375_v53 = vpop.eup %1374  ;;  %1268 = vmatprep.subr.mxu0 %v1610_v0  ;;  %1314 = vmatprep.subr.mxu1 %v1610_v0 }
 0x197   :  { %v584_v54 = vmul.f32 %v1375_v53, %v535_v18  ;;  %1269 = vmatpush3.msra.mxu0 %v767_v3  ;;  %1330 = vmatpush3.msra.mxu1 %v767_v3 }
 0x198   :  { %1270 = vmatprep.subr.mxu0 %v1610_v0  ;;  %1315 = vmatprep.subr.mxu1 %v1610_v0 }
 0x199   :  { %1246 = vmatmul.mubr.f32.gmra.mxu1 %v584_v54  ;;  %1271 = vmatpush3.msra.mxu0 %v766_v4 }
 0x19a   :  { %v1377_v55 = vpop.eup %1376  ;;  %1248 = vmatprep.mubr.msk.f32.mxu1 %vm1611_vm0, %v1610_v0  ;;  %1331 = vmatpush3.msra.mxu1 %v766_v4 }
 0x19b   :  { %v585_v56 = vmul.f32 %v1377_v55, %v536_v26  ;;  %1272 = vmatprep.subr.mxu0 %v1610_v0  ;;  %1316 = vmatprep.subr.mxu1 %v1610_v0 }
 0x19c   :  { %1273 = vmatpush3.msra.mxu0 %v765_v5  ;;  %1332 = vmatpush3.msra.mxu1 %v765_v5 }
 0x19d   :  { %1249 = vmatmul.mubr.f32.gmra.mxu1 %v585_v56  ;;  %1274 = vmatprep.subr.mxu0 %v1610_v0 }
 0x19e   :  { %v1379_v57 = vpop.eup %1378  ;;  %1251 = vmatprep.mubr.msk.f32.mxu1 %vm1611_vm0, %v1610_v0  ;;  %1317 = vmatprep.subr.mxu1 %v1610_v0 }
 0x19f   :  { %v586_v58 = vmul.f32 %v1379_v57, %v537_v33  ;;  %1275 = vmatpush3.msra.mxu0 %v764_v6  ;;  %1333 = vmatpush3.msra.mxu1 %v764_v6  ;;  %v926_v6 = vld [vmem:[%s1912_s10] ss:$0 sm:$0xff]  ;;  %s1612_s10 = smov [#allocation16]  }
 0x1a0   :  { %1276 = vmatprep.subr.mxu0 %v1610_v0  ;;  %1318 = vmatprep.subr.mxu1 %v1610_v0  ;;  %s894_s17 = sshll.u32 %s1612_s10, 4  ;;  %s895_s17 = int_to_ptr.vmem [resolvable:$true] %s894_s17 }
 0x1a1   :  { %1252 = vmatmul.mubr.f32.gmra.mxu1 %v586_v58  ;;  %1277 = vmatpush3.msra.mxu0 %v763_v7  ;;  %s1568_s18 = scalar_lea.vmem %s895_s17, 896  ;;  %p1573_p13 = scmp.lt.s32.totalorder %s895_s17, %s895_s17 }
 0x1a2   :  { %1298 = vmatprep.mubr.msk.f32.mxu1 %vm1611_vm0, %v1610_v0  ;;  %1334 = vmatpush3.msra.mxu1 %v763_v7  ;;  %p1569_p12 = scmp.ne.s32.totalorder %s895_s17, %s1568_s18  ;;  %p1574_p0 = scmp.lt.s32.totalorder %s1568_s18, %s1568_s18 }
 0x1a3   :  { %1278 = vmatprep.subr.mxu0 %v1610_v0  ;;  %1319 = vmatprep.subr.mxu1 %v1610_v0 }
 0x1a4   :  { %1279 = vmatpush3.msra.mxu0 %v762_v8  ;;  %1335 = vmatpush3.msra.mxu1 %v762_v8  ;;  %p1575_p1 = por %p1574_p0, %p1573_p13 }
 0x1a5   :  { %1280 = vmatprep.subr.mxu0 %v1610_v0  ;;  %1320 = vmatprep.subr.mxu1 %v1610_v0 }
 0x1a6   :  { %1281 = vmatpush3.msra.mxu0 %v761_v9  ;;  %1336 = vmatpush3.msra.mxu1 %v761_v9  ;;  %p1576_p2 = pnand %p1575_p1, %p1569_p12 }
 0x1a7   :  { %1282 = vmatprep.subr.mxu0 %v1610_v0  ;;  %1321 = vmatprep.subr.mxu1 %v1610_v0 }
 0x1a8   :  { %1283 = vmatpush3.msra.mxu0 %v760_v10  ;;  %1337 = vmatpush3.msra.mxu1 %v760_v10 }
 0x1a9   :  { %1284 = vmatprep.subr.mxu0 %v1610_v0  ;;  %1322 = vmatprep.subr.mxu1 %v1610_v0 }
 0x1aa   :  { %1285 = vmatpush3.msra.mxu0 %v759_v11  ;;  %1338 = vmatpush3.msra.mxu1 %v759_v11 }
 0x248   :  { %v676_v13 = vpop.f32.mrf.mxu1 }
 0x249   :  { %v677_v14 = vadd.f32 %v918_v12, %v676_v13 }
 0x24a   :  { %v1235_v15 = vpop.f32.mrf.mxu1 }
 0x24b   :  { %v919_v16 = vmul.f32 -1.442695, %v677_v14 }
 0x24c   :  { %v681_v17 = vpop.f32.mrf.mxu1 }
 0x24d   :  { %1380 = vpow2.f32 %v919_v16  ;;  %v682_v18 = vadd.f32 %v918_v12, %v681_v17 }
 0x24e   :  { %v1238_v19 = vpop.f32.mrf.mxu1 }
 0x24f   :  { %v920_v20 = vmul.f32 -1.442695, %v682_v18 }
 0x250   :  { %v686_v21 = vpop.f32.mrf.mxu1 }
 0x251   :  { %1382 = vpow2.f32 %v920_v20  ;;  %v687_v22 = vadd.f32 %v918_v12, %v686_v21 }
 0x252   :  { %v1241_v23 = vpop.f32.mrf.mxu1 }
 0x253   :  { %v921_v24 = vmul.f32 -1.442695, %v687_v22 }
 0x254   :  { %v691_v25 = vpop.f32.mrf.mxu1 }
 0x255   :  { %1384 = vpow2.f32 %v921_v24  ;;  %v692_v26 = vadd.f32 %v918_v12, %v691_v25 }
 0x256   :  { %v1244_v27 = vpop.f32.mrf.mxu1 }
 0x257   :  { %v922_v28 = vmul.f32 -1.442695, %v692_v26 }
 0x259   :  { %1386 = vpow2.f32 %v922_v28  ;;  %v696_v29 = vpop.f32.mrf.mxu1 }
 0x25a   :  { %v1381_v30 = vpop.eup %1380  ;;  %v697_v31 = vadd.f32 %v918_v12, %v696_v29 }
 0x25b   :  { %v731_v32 = vadd.f32 1.0, %v1381_v30  ;;  %v1247_v33 = vpop.f32.mrf.mxu1 }
 0x25c   :  { %v923_v34 = vmul.f32 -1.442695, %v697_v31 }
 0x25d   :  { %1388 = vrcp.f32 %v731_v32  ;;  %v701_v35 = vpop.f32.mrf.mxu1 }
 0x25e   :  { %v1383_v36 = vpop.eup %1382  ;;  %1390 = vpow2.f32 %v923_v34  ;;  %v702_v37 = vadd.f32 %v918_v12, %v701_v35 }
 0x25f   :  { %v732_v38 = vadd.f32 1.0, %v1383_v36  ;;  %v1250_v39 = vpop.f32.mrf.mxu1 }
 0x260   :  { %v924_v40 = vmul.f32 -1.442695, %v702_v37 }
 0x261   :  { %1392 = vrcp.f32 %v732_v38  ;;  %v706_v41 = vpop.f32.mrf.mxu1 }
 0x262   :  { %v1385_v42 = vpop.eup %1384  ;;  %1394 = vpow2.f32 %v924_v40  ;;  %v707_v43 = vadd.f32 %v918_v12, %v706_v41 }
 0x263   :  { %v733_v44 = vadd.f32 1.0, %v1385_v42  ;;  %v1253_v45 = vpop.f32.mrf.mxu1 }
 0x264   :  { %v925_v46 = vmul.f32 -1.442695, %v707_v43 }
 0x265   :  { %1396 = vrcp.f32 %v733_v44 }
 0x266   :  { %v1387_v47 = vpop.eup %1386  ;;  %1398 = vpow2.f32 %v925_v46 }
 0x267   :  { %v734_v48 = vadd.f32 1.0, %v1387_v47 }
 0x269   :  { %1400 = vrcp.f32 %v734_v48 }
 0x26a   :  { %v1389_v49 = vpop.eup %1388 }
 0x26b   :  { %v1391_v50 = vpop.eup %1390  ;;  %v752_v51 = vmul.f32 %v1389_v49, %v677_v14 }
 0x26c   :  { %v735_v52 = vadd.f32 1.0, %v1391_v50 }
 0x26d   :  { %1287 = vmatmul.mubr.f32.vlgmr.msra.gmra.mxu0 %v752_v51 }
 0x26e   :  { %v1393_v53 = vpop.eup %1392  ;;  %1402 = vrcp.f32 %v735_v52  ;;  %1289 = vmatprep.mubr.msk.f32.mxu0 %vm1611_vm0, %v1610_v0 }
 0x26f   :  { %v1395_v54 = vpop.eup %1394  ;;  %v753_v55 = vmul.f32 %v1393_v53, %v682_v18 }
 0x270   :  { %v736_v56 = vadd.f32 1.0, %v1395_v54 }
 0x271   :  { %1290 = vmatmul.mubr.f32.gmra.mxu0 %v753_v55 }
 0x272   :  { %v1397_v57 = vpop.eup %1396  ;;  %1404 = vrcp.f32 %v736_v56  ;;  %1292 = vmatprep.mubr.msk.f32.mxu0 %vm1611_vm0, %v1610_v0 }
 0x273   :  { %v1399_v58 = vpop.eup %1398  ;;  %v754_v59 = vmul.f32 %v1397_v57, %v687_v22 }
 0x274   :  { %v737_v60 = vadd.f32 1.0, %v1399_v58 }
 0x275   :  { %1293 = vmatmul.mubr.f32.gmra.mxu0 %v754_v59 }
 0x276   :  { %v1401_v61 = vpop.eup %1400  ;;  %1406 = vrcp.f32 %v737_v60  ;;  %1295 = vmatprep.mubr.msk.f32.mxu0 %vm1611_vm0, %v1610_v0 }
 0x277   :  { %v755_v62 = vmul.f32 %v1401_v61, %v692_v26 }
 0x279   :  { %1296 = vmatmul.mubr.f32.gmra.mxu0 %v755_v62 }
 0x27b   :  { %v1403_v63 = vpop.eup %1402 }
 0x27c   :  { %v756_v1 = vmul.f32 %v1403_v63, %v697_v31 }
 0x27e   :  { %1299 = vmatmul.mubr.f32.vlgmr.msra.gmra.mxu1 %v756_v1 }
 0x27f   :  { %v1405_v2 = vpop.eup %1404  ;;  %1301 = vmatprep.mubr.msk.f32.mxu1 %vm1611_vm0, %v1610_v0 }
 0x280   :  { %v757_v3 = vmul.f32 %v1405_v2, %v702_v37 }
 0x282   :  { %1302 = vmatmul.mubr.f32.gmra.mxu1 %v757_v3 }
 0x283   :  { %v1407_v4 = vpop.eup %1406  ;;  %1304 = vmatprep.mubr.msk.f32.mxu1 %vm1611_vm0, %v1610_v0 }
 0x284   :  { %v758_v5 = vmul.f32 %v1407_v4, %v707_v43 }
 0x286   :  { %1305 = vmatmul.mubr.f32.gmra.mxu1 %v758_v5 }
 0x32d   :  { %v848_v7 = vpop.f32.mrf.mxu0 }
 0x32e   :  { %v849_v8 = vadd.f32 %v926_v6, %v848_v7 }
 0x32f   :  { %v1288_v9 = vpop.f32.mrf.mxu0 }
 0x330   :  { %882 = vst [vmem:[#allocation16] sm:$0xff] %v849_v8 }
 0x331   :  { %v853_v10 = vpop.f32.mrf.mxu0 }
 0x332   :  { %v854_v11 = vadd.f32 %v926_v6, %v853_v10 }
 0x333   :  { %v1291_v12 = vpop.f32.mrf.mxu0 }
 0x334   :  { %883 = vst [vmem:[#allocation16 + $0x8] sm:$0xff] %v854_v11 }
 0x335   :  { %v858_v13 = vpop.f32.mrf.mxu0 }
 0x336   :  { %v859_v14 = vadd.f32 %v926_v6, %v858_v13 }
 0x337   :  { %v1294_v15 = vpop.f32.mrf.mxu0 }
 0x338   :  { %884 = vst [vmem:[#allocation16 + $0x10] sm:$0xff] %v859_v14 }
 0x339   :  { %v863_v16 = vpop.f32.mrf.mxu0 }
 0x33a   :  { %v864_v0 = vadd.f32 %v926_v6, %v863_v16 }
 0x33b   :  { %v1297_v17 = vpop.f32.mrf.mxu0 }
 0x33c   :  { %885 = vst [vmem:[#allocation16 + $0x18] sm:$0xff] %v864_v0 }
 0x33e   :  { %v868_v18 = vpop.f32.mrf.mxu1 }
 0x33f   :  { %v869_v19 = vadd.f32 %v926_v6, %v868_v18 }
 0x340   :  { %v1300_v20 = vpop.f32.mrf.mxu1 }
 0x341   :  { %886 = vst [vmem:[#allocation16 + $0x20] sm:$0xff] %v869_v19 }
 0x342   :  { %v873_v21 = vpop.f32.mrf.mxu1 }
 0x343   :  { %v874_v22 = vadd.f32 %v926_v6, %v873_v21 }
 0x344   :  { %v1303_v23 = vpop.f32.mrf.mxu1 }
 0x345   :  { %887 = vst [vmem:[#allocation16 + $0x28] sm:$0xff] %v874_v22 }
 0x346   :  { %v878_v24 = vpop.f32.mrf.mxu1 }
 0x347   :  { %v879_v25 = vadd.f32 %v926_v6, %v878_v24 }
 0x348   :  { %v1306_v26 = vpop.f32.mrf.mxu1 }
 0x349   :  { %888 = vst [vmem:[#allocation16 + $0x30] sm:$0x3] %v879_v25 }
 0x34a   :  { %1579 = shalt.err (!%p1576_p2)
}
 0x34b   :  { %900 = dma.vmem_to_hbm [thread:$0]  %s895_s17, 896, %s1913_s11, [#allocation4], %s1602_s22, %s1602_s22, %s1603_s23  }
 0x34c   :  { %1598 = dma.done.wait [#allocation4], 896  }
 0x34d   :  { %1599 = vsyncadd [#allocation4], 4294966400 }
 0x34e   :  { %904 = vsyncpa [#allocation3], 1 }
 0x34f   :  { %905 = vsyncpa [#allocation6], 1 }
 0x350   :  { %906 = vsyncpa [#allocation9], 1 }
 0x351   :  { %907 = vsyncpa [#allocation12], 1 }
 0x352   :  { %908 = vsyncpa [#allocation15], 1 }
 0x353   :  { %909 = vsyncpa [#allocation4], 1 }

</bundles_post_ra>
